<compile_context>
chip_gen: v5e
topology: v5e:2x2
jax: 0.10.0
libtpu: 0.0.40
codegen_flags: <defaults>
</compile_context>

<pallas_src>
import functools

import jax
import jax.numpy as jnp
from jax import lax
from jax.experimental import pallas as pl
from jax.experimental.pallas import tpu as pltpu


def _round_up(x, m):
    return ((x + m - 1) // m) * m


def _geglu_kernel(x_ref, w_ref, b_ref, o_ref, *, approximate):
    # x_ref: (1, C_in, tt)    activation tile, NCHW token order
    # w_ref: (2, tn, C_in)    stacked [value-path; gate-path] weight tile
    # b_ref: (2, tn, 1)       stacked biases
    # o_ref: (1, tn, tt)
    x = x_ref[0]                                    # (C_in, tt), native dtype to MXU
    tn = w_ref.shape[1]
    c_in = w_ref.shape[2]

    # One fused MXU contraction: (2*tn, C_in) @ (C_in, tt) -> (2*tn, tt) f32.
    w = w_ref[...].reshape(2 * tn, c_in)
    hg = jnp.dot(w, x, preferred_element_type=jnp.float32)
    hg = hg + b_ref[...].reshape(2 * tn, 1).astype(jnp.float32)

    h = hg[:tn]          # value path
    g = hg[tn:]          # gate path

    if approximate:
        # tanh-form GELU: tanh runs on the EUP (separate VLIW slot).
        c = 0.7978845608028654  # sqrt(2/pi)
        gate = 0.5 * g * (1.0 + jnp.tanh(c * (g + 0.044715 * g * g * g)))
    else:
        # Exact erf-based GELU (PyTorch F.gelu default), f32 epilogue.
        gate = 0.5 * g * (1.0 + lax.erf(g * 0.7071067811865475))

    o_ref[0] = (h * gate).astype(o_ref.dtype)


def geglu_pallas(x_nchw, w_conv, b_conv, *, tile_tok=512, tile_n=256,
                 approximate_gelu=False, compute_dtype=None):
    """GEGLU forward, NCHW end-to-end (no layout round-trips, no pad copies).

    x_nchw: (N, C_in, H, W)
    w_conv: (2*dim_out, C_in, 1, 1)   -- Conv2d 1x1 weight (value rows then gate rows)
    b_conv: (2*dim_out,)              -- Conv2d bias
    returns (N, dim_out, H, W) in x's original dtype.
    """
    N, C_in, H, W = x_nchw.shape
    two_dim_out = w_conv.shape[0]
    dim_out = two_dim_out // 2
    HW = H * W
    orig_dtype = x_nchw.dtype

    # Stacked weight / bias: index 0 = value path, index 1 = gate path. These are tiny
    # reshapes of the parameters (no activation-sized copies).
    w_stack = w_conv.reshape(two_dim_out, C_in).reshape(2, dim_out, C_in)
    b_stack = b_conv.reshape(2, dim_out, 1)

    if compute_dtype is not None:
        # e.g. bf16 on v6e/v7x: halves operand HBM bytes, keeps f32 accumulation.
        x_nchw = x_nchw.astype(compute_dtype)
        w_stack = w_stack.astype(compute_dtype)

    x_tok = x_nchw.reshape(N, C_in, HW)  # free reshape, layout unchanged
    itemsize = jnp.dtype(x_tok.dtype).itemsize

    # ---- token (lane) tiling: keep tiles lane-aligned; no wrapper padding --------
    tile_tok = max(128, (tile_tok // 128) * 128)
    if HW % 128 == 0:
        tile_tok = min(tile_tok, HW)
    elif HW < 128:
        tile_tok = HW                       # single full-dim block (always legal)
    else:
        tile_tok = min(tile_tok, (HW // 128) * 128)  # lane-aligned; last block partial

    # ---- output-channel tiling ---------------------------------------------------
    if dim_out <= tile_n:
        tn = dim_out                        # full dim (may give masked stores if %8!=0;
                                            # correctness is unaffected)
    else:
        tn = max(8, (tile_n // 8) * 8)

    n_t = pl.cdiv(HW, tile_tok)
    n_o = pl.cdiv(dim_out, tn)

    # v7x has 2 TensorCores: avoid a 1-program grid for tiny layers.
    if N * n_o * n_t < 2 and HW > 128:
        tile_tok = _round_up(-(-HW // 2), 128)
        n_t = pl.cdiv(HW, tile_tok)

    # ---- grid ordering: keep the cheaper operand resident -------------------------
    # HBM traffic (per batch element, in elements):
    x_slab = C_in * HW
    w_total = 2 * dim_out * C_in
    cost_w_resident = n_o * x_slab + w_total      # grid (n, o, t): weight resident over t
    cost_x_resident = x_slab + n_t * w_total      # grid (n, t, o): x resident over o
    x_resident = cost_x_resident < cost_w_resident

    if x_resident:
        grid = (N, n_t, n_o)
        x_index = lambda n, t, o: (n, 0, t)
        w_index = lambda n, t, o: (0, o, 0)
        o_index = lambda n, t, o: (n, o, t)
    else:
        grid = (N, n_o, n_t)
        x_index = lambda n, o, t: (n, 0, t)
        w_index = lambda n, o, t: (0, o, 0)
        o_index = lambda n, o, t: (n, o, t)

    # Deeper pipelining on the streaming activation when C_in is small (the per-step
    # matmul is too short to cover the strided x DMA).
    x_buffered = (not x_resident) and (C_in <= 512) and (n_t > 2)
    if x_buffered:
        x_spec = pl.BlockSpec((1, C_in, tile_tok), x_index,
                              pipeline_mode=pl.Buffered(3))
    else:
        x_spec = pl.BlockSpec((1, C_in, tile_tok), x_index)

    # ---- VMEM budget: blocks (double/triple buffered) + f32 epilogue temporaries --
    x_blk = C_in * tile_tok * itemsize
    w_blk = 2 * tn * C_in * itemsize
    b_blk = 2 * tn * 128 * jnp.dtype(b_stack.dtype).itemsize   # lane-padded 1 -> 128
    o_blk = tn * tile_tok * itemsize
    epi = 4 * tn * tile_tok * 4                                # hg/h/g/gelu f32 temps
    x_bufs = 3 if x_buffered else 2
    vmem_needed = x_bufs * x_blk + 2 * (w_blk + b_blk + o_blk) + epi + (4 << 20)
    # Defaults keep this well under v7x's 64 MiB physical VMEM; cap below v5e/v6e's 128.
    vmem_limit = int(min(max(vmem_needed, 16 << 20), 100 << 20))

    out = pl.pallas_call(
        functools.partial(_geglu_kernel, approximate=approximate_gelu),
        out_shape=jax.ShapeDtypeStruct((N, dim_out, HW), orig_dtype),
        grid_spec=pltpu.PrefetchScalarGridSpec(
            num_scalar_prefetch=0,
            grid=grid,
            in_specs=[
                x_spec,
                pl.BlockSpec((2, tn, C_in), w_index),
                pl.BlockSpec((2, tn, 1), w_index),
            ],
            out_specs=pl.BlockSpec((1, tn, tile_tok), o_index),
        ),
        compiler_params=pltpu.CompilerParams(
            dimension_semantics=("parallel", "parallel", "parallel"),
            vmem_limit_bytes=vmem_limit,
        ),
    )(x_tok, w_stack, b_stack)

    return out.reshape(N, dim_out, H, W)


def geglu_reference(x_nchw, w_conv, b_conv):
    """Pure-JAX reference matching the PyTorch GEGLU module (exact erf GELU)."""
    two_dim_out = w_conv.shape[0]
    dim_out = two_dim_out // 2
    C_in = x_nchw.shape[1]
    w_mat = w_conv.reshape(two_dim_out, C_in)  # (O, I)
    proj = jnp.einsum("oi,nihw->nohw", w_mat, x_nchw) + b_conv[None, :, None, None]
    h, gate = proj[:, :dim_out], proj[:, dim_out:]
    return h * jax.nn.gelu(gate, approximate=False)


if __name__ == "__main__":
    key = jax.random.PRNGKey(0)
    k_x, k_w, k_b, k_x2, k_w2, k_b2 = jax.random.split(key, 6)

    # --- Test 1: small shapes consistent with the module; divisible tiles -----------
    N, dim_in, H, W = 2, 4, 16, 16
    dim_out = 8

    x = jax.random.normal(k_x, (N, dim_in, H, W), dtype=jnp.float32)
    w_conv = jax.random.normal(k_w, (2 * dim_out, dim_in, 1, 1), dtype=jnp.float32) * 0.1
    b_conv = jax.random.normal(k_b, (2 * dim_out,), dtype=jnp.float32) * 0.1

    out = jax.block_until_ready(geglu_pallas(x, w_conv, b_conv))
    ref = geglu_reference(x, w_conv, b_conv)
    assert out.shape == (N, dim_out, H, W), out.shape
    assert jnp.allclose(out, ref, atol=1e-5, rtol=1e-5), float(jnp.max(jnp.abs(out - ref)))

    # Approximate (tanh / EUP) GELU path — small deviation from the exact-erf reference.
    out_approx = jax.block_until_ready(
        geglu_pallas(x, w_conv, b_conv, approximate_gelu=True))
    assert jnp.allclose(out_approx, ref, atol=2e-2, rtol=2e-2)

    # --- Test 2: non-divisible spatial / channel counts (edge-block handling, no pads)
    N2, dim_in2, H2, W2 = 2, 6, 10, 10
    dim_out2 = 12
    x2 = jax.random.normal(k_x2, (N2, dim_in2, H2, W2), dtype=jnp.float32)
    w2 = jax.random.normal(k_w2, (2 * dim_out2, dim_in2, 1, 1), dtype=jnp.float32) * 0.1
    b2 = jax.random.normal(k_b2, (2 * dim_out2,), dtype=jnp.float32) * 0.1

    out2 = jax.block_until_ready(geglu_pallas(x2, w2, b2))
    ref2 = geglu_reference(x2, w2, b2)
    assert out2.shape == (N2, dim_out2, H2, W2), out2.shape
    assert jnp.allclose(out2, ref2, atol=1e-5, rtol=1e-5), float(jnp.max(jnp.abs(out2 - ref2)))

    print("KERNEL_OK")
</pallas_src>

<mosaic_0001>
module attributes {stable_mosaic.version = 11 : i64} {
  func.func @_geglu_kernel(%arg0: i32, %arg1: i32, %arg2: i32, %arg3: memref<1x4x256xf32, #tpu.memory_space<vmem>>, %arg4: memref<2x8x4xf32, #tpu.memory_space<vmem>>, %arg5: memref<2x8x1xf32, #tpu.memory_space<vmem>>, %arg6: memref<1x8x256xf32, #tpu.memory_space<vmem>>) attributes {dimension_semantics = [#tpu.dimension_semantics<parallel>, #tpu.dimension_semantics<parallel>, #tpu.dimension_semantics<parallel>], iteration_bounds = array<i64: 2, 1, 1>, scalar_prefetch = 0 : i64, scratch_operands = 0 : i64, tpu.core_type = #tpu.core_type<tc>, window_params = [{transform_indices = @transform_0, window_bounds = array<i64: 1, 4, 256>}, {transform_indices = @transform_1, window_bounds = array<i64: 2, 8, 4>}, {transform_indices = @transform_2, window_bounds = array<i64: 2, 8, 1>}, {transform_indices = @transform_3, window_bounds = array<i64: 1, 8, 256>}]} {
    %c0 = arith.constant 0 : index
    %c0_0 = arith.constant 0 : index
    %c0_1 = arith.constant 0 : index
    %0 = vector.load %arg3[%c0, %c0_0, %c0_1] : memref<1x4x256xf32, #tpu.memory_space<vmem>>, vector<1x4x256xf32>
    %1 = vector.shape_cast %0 : vector<1x4x256xf32> to vector<4x256xf32>
    %c0_2 = arith.constant 0 : index
    %c0_3 = arith.constant 0 : index
    %c0_4 = arith.constant 0 : index
    %2 = vector.load %arg4[%c0_2, %c0_3, %c0_4] : memref<2x8x4xf32, #tpu.memory_space<vmem>>, vector<2x8x4xf32>
    %3 = vector.shape_cast %2 : vector<2x8x4xf32> to vector<16x4xf32>
    %cst = arith.constant dense<0.000000e+00> : vector<16x256xf32>
    %4 = tpu.matmul %3, %1, %cst {dimension_numbers = #tpu.dot_dimension_numbers<[1], [0], [0], [1], [0, 0, 1, 1], [], []>} : vector<16x4xf32>, vector<4x256xf32>, vector<16x256xf32> -> vector<16x256xf32>
    %c0_5 = arith.constant 0 : index
    %c0_6 = arith.constant 0 : index
    %c0_7 = arith.constant 0 : index
    %5 = vector.load %arg5[%c0_5, %c0_6, %c0_7] : memref<2x8x1xf32, #tpu.memory_space<vmem>>, vector<2x8x1xf32>
    %6 = vector.shape_cast %5 : vector<2x8x1xf32> to vector<16x1xf32>
    %7 = vector.broadcast %6 : vector<16x1xf32> to vector<16x256xf32>
    %8 = arith.addf %4, %7 : vector<16x256xf32>
    %9 = vector.extract_strided_slice %8 {offsets = [0, 0], sizes = [8, 256], strides = [1, 1]} : vector<16x256xf32> to vector<8x256xf32>
    %10 = vector.extract_strided_slice %8 {offsets = [8, 0], sizes = [8, 256], strides = [1, 1]} : vector<16x256xf32> to vector<8x256xf32>
    %cst_8 = arith.constant 5.000000e-01 : f32
    %11 = vector.broadcast %cst_8 : f32 to vector<8x256xf32>
    %12 = arith.mulf %11, %10 : vector<8x256xf32>
    %cst_9 = arith.constant 0.707106769 : f32
    %13 = vector.broadcast %cst_9 : f32 to vector<8x256xf32>
    %14 = arith.mulf %10, %13 : vector<8x256xf32>
    %15 = math.erf %14 : vector<8x256xf32>
    %cst_10 = arith.constant 1.000000e+00 : f32
    %16 = vector.broadcast %cst_10 : f32 to vector<8x256xf32>
    %17 = arith.addf %16, %15 : vector<8x256xf32>
    %18 = arith.mulf %12, %17 : vector<8x256xf32>
    %19 = arith.mulf %9, %18 : vector<8x256xf32>
    %c0_11 = arith.constant 0 : index
    %c0_12 = arith.constant 0 : index
    %c0_13 = arith.constant 0 : index
    %20 = vector.load %arg6[%c0_11, %c0_12, %c0_13] : memref<1x8x256xf32, #tpu.memory_space<vmem>>, vector<1x8x256xf32>
    %21 = vector.shape_cast %20 : vector<1x8x256xf32> to vector<8x256xf32>
    %22 = vector.shape_cast %19 : vector<8x256xf32> to vector<1x8x256xf32>
    tpu.vector_store %arg6[%c0_11, %c0_12, %c0_13], %22 {strides = array<i32>} : memref<1x8x256xf32, #tpu.memory_space<vmem>>, vector<1x8x256xf32>,
    return
  }
  func.func @transform_0(%arg0: i32, %arg1: i32, %arg2: i32) -> (i32, i32, i32) {
    %c0_i32 = arith.constant 0 : i32
    %c0_i32_0 = arith.constant 0 : i32
    return %arg0, %c0_i32, %arg2 : i32, i32, i32
  }
  func.func @transform_1(%arg0: i32, %arg1: i32, %arg2: i32) -> (i32, i32, i32) {
    %c0_i32 = arith.constant 0 : i32
    %c0_i32_0 = arith.constant 0 : i32
    %c0_i32_1 = arith.constant 0 : i32
    return %c0_i32, %arg1, %c0_i32_0 : i32, i32, i32
  }
  func.func @transform_2(%arg0: i32, %arg1: i32, %arg2: i32) -> (i32, i32, i32) {
    %c0_i32 = arith.constant 0 : i32
    %c0_i32_0 = arith.constant 0 : i32
    %c0_i32_1 = arith.constant 0 : i32
    return %c0_i32, %arg1, %c0_i32_0 : i32, i32, i32
  }
  func.func @transform_3(%arg0: i32, %arg1: i32, %arg2: i32) -> (i32, i32, i32) {
    %c0_i32 = arith.constant 0 : i32
    return %arg0, %arg1, %arg2 : i32, i32, i32
  }
}

</mosaic_0001>

<bundles_post_ra>
// kernel: tpu_custom_call.1
= control target key start
LH: loop header
LB: loop body
LE: loop exit
PB: predicated region body
PF: predicated region fallthrough
CT: control target
= control target key end

     0   :  { %8 = vsyncpa [#allocation3], 0  ;;  %s864_s0 = inlined_call_operand.vmem [shape: f32[2,4,256], index: 0, kind: input, shape index: {}]   ;;  %s865_s1 = inlined_call_operand.vmem [shape: f32[2,8,4], index: 1, kind: input, shape index: {}]   ;;  %s866_s2 = inlined_call_operand.vmem [shape: f32[2,8,1], index: 2, kind: input, shape index: {}]   ;;  %s867_s3 = inlined_call_operand.hbm [shape: f32[2,8,256], index: 3, kind: output, shape index: {}]  }
   0x1   :  { %10 = vsyncpa [#allocation3 + $0x1], 0  ;;  %s733_s12 = smov 0   ;;  %s735_s13 = smov 0  }
   0x2   :  { %s737_s14 = smov 0   ;;  %s739_s15 = smov 0  }
   0x3   :  { %s741_s16 = smov 0   ;;  %s743_s17 = smov 0  }
   0x4 LB: > { %s544_s18 = sadd.s32 4294967295, %s710_s17   ;;  %s545_s19 = sadd.s32 4294967294, %s710_s17   ;;  %s710_s17 = sphi %s743_s17, %s16_s17   ;;  %s706_s16 = sphi %s741_s16, %s874_s16   ;;  %s702_s15 = sphi %s739_s15, %s873_s15   ;;  %s698_s14 = sphi %s737_s14, %s872_s14   ;;  %s694_s13 = sphi %s735_s13, %s871_s13   ;;  %s690_s12 = sphi %s733_s12, %s870_s12  }
   0x5   : > { %s35_s20 = sadd.s32 1, %s706_s16  ;;  %s126_s21 = sadd.s32 1, %s698_s14 }
   0x6   : > { %p37_p0 = scmp.ge.s32.totalorder %s35_s20, 2  ;;  %p136_p1 = scmp.ne.s32.totalorder %s698_s14, %s694_s13 }
   0x7   : > { %p137_p2 = scmp.eq.s32.totalorder %s544_s18, 1  ;;  %p142_p3 = scmp.ne.s32.totalorder %s694_s13, %s690_s12 }
   0x8   : > { %s876_s20 = smov (%p37_p0, %s35_s20), 0  ;;  %p143_p5 = scmp.eq.s32.totalorder %s545_s19, 1 }
   0x9   : > { %p773_p4 = por %p137_p2, %p136_p1  ;;  %s119_s23 = ssub.s32 %s706_s16, %s876_s20 }
   0xa   : > { %p550_p6 = scmp.ge.s32.totalorder %s710_s17, 1  ;;  %p124_p7 = scmp.eq.s32.totalorder %s119_s23, 0 }
   0xb   : > { %p780_p8 = por %p143_p5, %p142_p3  ;;  %p188_p9 = scmp.lt.s32.totalorder %s710_s17, 3 }
   0xc   : > { %s786_s25 = scalar_select %p124_p7, %s698_s14, %s126_s21  }
   0xd   : > { %p189_p10 = pnand %p550_p6, %p188_p9 }
   0xe   : > { %p225_p11 = scmp.lt.s32.totalorder (!%p189_p10), %s702_s15, 1  ;;  %s221_s18 = sand.u32 (!%p189_p10), 1, %s694_s13  }
   0xf   : > { %192 = sbr.rel (%p189_p10) target bundleno = 225 (0xe1), region = 32  ;;  %s551_s19 = sshll.u32 (!%p189_p10), %s221_s18, 4 }
  0x10   : > { %s568_s21 = sshll.u32 (!%p189_p10), %s702_s15, 4  ;;  %s413_s30 = scalar_lea.sflag (!%p189_p10), [#allocation3], %s221_s18 }
  0x11   : > { %s428_s27 = scalar_lea.hbm (!%p189_p10), %s867_s3, %s568_s21  ;;  %s652_s8 = scalar_lea.hbm (!%p189_p10), %s867_s3, 32 }
  0x14   : > { %v712_v0 = vmov 0   ;;  %v247_v1 = vld [vmem:[%s866_s2 + $0x8] sm:$0xff]  ;;  %s226_s28 = scalar_select %p225_p11, %s702_s15, 1  ;;  %v246_v3 = vld [vmem:[%s866_s2] sm:$0xff]  ;;  %vm269_vm0 = vcmask 1043456   ;;  %vm262_vm1 = vcmask 31744  }
  0x15   : > { %627 = vset.pattern.permute.xlu0 %v712_v0  ;;  %v245_v4 = vld [vmem:[%s865_s1 + $0x8] sm:$0xff]  ;;  %v244_v7 = vld [vmem:[%s865_s1] sm:$0xff]  ;;  %s223_s15 = scalar_lea.vmem [#allocation2], %s551_s19 }
  0x16   : > { %255 = vperm.xlu0 %627, %v247_v1   ;;  %s567_s29 = sshll.u32 %s226_s28, 3  ;;  %s430_s28 = sshll.u32 %s223_s15, 4  ;;  %s431_s28 = int_to_ptr.vmem [resolvable:$true] %s430_s28 }
  0x17   : > { %s232_s5 = scalar_lea.vmem %s864_s0, %s567_s29  ;;  %s432_s29 = sshll.u32 %s428_s27, 4  ;;  %s433_s29 = int_to_ptr.hbm [resolvable:$true] %s432_s29 }
  0x18   : > { %v243_v2 = vld [vmem:[%s232_s5] sm:$0xff]  ;;  %s646_s4 = sshra.s32 %s433_s29, 4  ;;  %s647_s4 = int_to_ptr.hbm [resolvable:$true] %s646_s4 }
  0x19   : > { %259 = vst [vmem:[#allocation1] ss:$2 sm:$0xff] %v243_v2  ;;  %s648_s5 = scalar_lea.hbm %s647_s4, 16  ;;  %p653_p1 = scmp.lt.s32.totalorder %s647_s4, %s867_s3 }
  0x1a   : > { %p649_p12 = scmp.ne.s32.totalorder %s647_s4, %s648_s5  ;;  %p654_p2 = scmp.lt.s32.totalorder %s652_s8, %s648_s5 }
  0x1c   : > { %p650_p13 = pnand %p649_p12, %p773_p4  ;;  %p655_p3 = por %p654_p2, %p653_p1 }
  0x1e   : > { %250 = vperm.xlu0 %627, %v246_v3   ;;  %p651_p0 = pneg %p650_p13 }
  0x20   : > { %v260_v5 = vld.sshfl [vmem:[#allocation1] sm:$0xff pattern:$0x75316420]  ;;  %v261_v6 = vld.sshfl [vmem:[#allocation1 + $0x8] sm:$0xff pattern:$0x75316420]  ;;  %p656_p5 = pnand %p655_p3, %p651_p0 }
  0x21   : > { %569 = vmatpush.msk.msra.mxu2 %vm269_vm0, %v260_v5  ;;  %570 = vmatpush.msk.msra.mxu3 %vm269_vm0, %v261_v6 }
  0x22   : > { %556 = vmatmul.msk.f32.vlgmr.msra.gmra.mxu2 %vm262_vm1, %v245_v4  ;;  %559 = vmatmul.msk.f32.vlgmr.msra.gmra.mxu3 %vm262_vm1, %v245_v4 }
  0x23   : > { %554 = vmatpush.msk.msra.mxu0 %vm269_vm0, %v260_v5  ;;  %557 = vmatpush.msk.msra.mxu1 %vm269_vm0, %v261_v6 }
  0x24   : > { %555 = vmatmul.msk.f32.vlgmr.msra.gmra.mxu0 %vm262_vm1, %v244_v7  ;;  %558 = vmatmul.msk.f32.vlgmr.msra.gmra.mxu1 %vm262_vm1, %v244_v7 }
  0x88   : > { %v256_v8 = vpop.permute.xlu0 %255 }
  0xa5   : > { %v294_v9 = vpop.f32.mrf.mxu2  ;;  %v317_v10 = vpop.f32.mrf.mxu3 }
  0xa6   : > { %v805_v11 = vadd.f32 %v294_v9, %v256_v8  ;;  %v807_v12 = vadd.f32 %v317_v10, %v256_v8 }
  0xa8   : > { %v810_v13 = vmul.f32 0.70710677, %v805_v11  ;;  %v813_v14 = vmul.f32 0.70710677, %v807_v12 }
  0xaa   : > { %v324_v15 = vmul.f32 %v810_v13, %v810_v13  ;;  %v364_v16 = vmul.f32 %v813_v14, %v813_v14 }
  0xac   : > { %v325_v17 = vmin.f32 %v324_v15, 16.0  ;;  %v365_v18 = vmin.f32 %v364_v16, 16.0 }
  0xae   : > { %v326_v19 = vmul.f32 2.1237322e-06, %v325_v17  ;;  %v337_v20 = vmul.f32 3.8918573e-05, %v325_v17  ;;  %v366_v21 = vmul.f32 2.1237322e-06, %v365_v18 }
  0xaf   : > { %v377_v22 = vmul.f32 3.8918573e-05, %v365_v18 }
  0xb0   : > { %v327_v23 = vadd.f32 0.00028619796, %v326_v19  ;;  %v338_v24 = vadd.f32 0.001143296, %v337_v20  ;;  %v367_v25 = vadd.f32 0.00028619796, %v366_v21 }
  0xb1   : > { %v378_v26 = vadd.f32 0.001143296, %v377_v22 }
  0xb2   : > { %v328_v27 = vmul.f32 %v327_v23, %v325_v17  ;;  %v339_v28 = vmul.f32 %v338_v24, %v325_v17  ;;  %v368_v29 = vmul.f32 %v367_v25, %v365_v18  ;;  %v251_v24 = vpop.permute.xlu0 %250  ;;  %v291_v25 = vpop.f32.mrf.mxu0 }
  0xb3   : > { %v379_v30 = vmul.f32 %v378_v26, %v365_v18 }
  0xb4   : > { %v329_v31 = vadd.f32 0.0036580483, %v328_v27  ;;  %v340_v32 = vadd.f32 0.014752088, %v339_v28  ;;  %v369_v35 = vadd.f32 0.0036580483, %v368_v29 }
  0xb5   : > { %v380_v33 = vadd.f32 0.014752088, %v379_v30  ;;  %v321_v28 = vmul.f32 0.5, %v807_v12  ;;  %v292_v30 = vadd.f32 %v291_v25, %v251_v24 }
  0xb6   : > { %v341_v34 = vmul.f32 %v340_v32, %v325_v17  ;;  %v330_v37 = vmul.f32 %v329_v31, %v325_v17  ;;  %v370_v41 = vmul.f32 %v369_v35, %v365_v18 }
  0xb7   : > { %v381_v36 = vmul.f32 %v380_v33, %v365_v18 }
  0xb8   : > { %v342_v38 = vadd.f32 0.112945676, %v341_v34  ;;  %v331_v43 = vadd.f32 0.05243302, %v330_v37  ;;  %v371_v47 = vadd.f32 0.05243302, %v370_v41 }
  0xb9   : > { %v382_v39 = vadd.f32 0.112945676, %v381_v36 }
  0xba   : > { %v343_v40 = vmul.f32 %v342_v38, %v325_v17  ;;  %v332_v49 = vmul.f32 %v331_v43, %v325_v17  ;;  %v372_v52 = vmul.f32 %v371_v47, %v365_v18 }
  0xbb   : > { %v383_v42 = vmul.f32 %v382_v39, %v365_v18 }
  0xbc   : > { %v344_v44 = vadd.f32 0.4994258, %v343_v40  ;;  %v333_v53 = vadd.f32 0.18741608, %v332_v49  ;;  %v373_v54 = vadd.f32 0.18741608, %v372_v52 }
  0xbd   : > { %v384_v45 = vadd.f32 0.4994258, %v383_v42 }
  0xbe   : > { %v345_v46 = vmul.f32 %v344_v44, %v325_v17  ;;  %v334_v56 = vmul.f32 %v333_v53, %v325_v17  ;;  %v374_v59 = vmul.f32 %v373_v54, %v365_v18 }
  0xbf   : > { %v385_v48 = vmul.f32 %v384_v45, %v365_v18 }
  0xc0   : > { %v346_v50 = vadd.f32 1.0, %v345_v46  ;;  %v335_v62 = vadd.f32 1.1283791, %v334_v56  ;;  %v375_v4 = vadd.f32 1.1283791, %v374_v59 }
  0xc1   : > { %v386_v51 = vadd.f32 1.0, %v385_v48 }
  0xc2   : > { %628 = vrcp.f32 %v346_v50  ;;  %v358_v63 = vand.u32 2147483648, %v346_v50  ;;  %v356_v2 = vand.u32 2147483647, %v346_v50  ;;  %vm352_vm4 = vweird.f32 %v346_v50 }
  0xc3   : > { %630 = vrcp.f32 %v386_v51  ;;  %v398_v3 = vand.u32 2147483648, %v386_v51  ;;  %v396_v6 = vand.u32 2147483647, %v386_v51  ;;  %vm392_vm6 = vweird.f32 %v386_v51 }
  0xc4   : > { %v359_v8 = vor.u32 1.1754944e-38, %v358_v63  ;;  %v336_v10 = vmul.f32 %v335_v62, %v810_v13  ;;  %vm357_vm7 = vcmp.eq.f32.partialorder %v356_v2, 8.507059e+37  ;;  %v376_v18 = vmul.f32 %v375_v4, %v813_v14  ;;  %v314_v14 = vpop.f32.mrf.mxu1 }
  0xc5   : > { %v399_v16 = vor.u32 1.1754944e-38, %v398_v3  ;;  %vm397_vm9 = vcmp.eq.f32.partialorder %v396_v6, 8.507059e+37  ;;  %v320_v13 = vmul.f32 0.5, %v805_v11  ;;  %v315_v32 = vadd.f32 %v314_v14, %v251_v24 }
  0xc8   : > { %v629_v55 = vpop.eup %628 }
  0xc9   : > { %v631_v57 = vpop.eup %630  ;;  %v348_v58 = vmul.f32 %v629_v55, %v346_v50  ;;  %vm353_vm2 = vweird.f32 %v629_v55 }
  0xca   : > { %v388_v60 = vmul.f32 %v631_v57, %v386_v51  ;;  %vm393_vm3 = vweird.f32 %v631_v57  ;;  %vm354_vm5 = vmor %vm352_vm4, %vm353_vm2 }
  0xcb   : > { %v349_v61 = vsub.f32 1.0, %v348_v58  ;;  %vm394_vm8 = vmor %vm392_vm6, %vm393_vm3 }
  0xcc   : > { %v389_v0 = vsub.f32 1.0, %v388_v60 }
  0xcd   : > { %v350_v1 = vmul.f32 %v629_v55, %v349_v61 }
  0xce   : > { %v390_v5 = vmul.f32 %v631_v57, %v389_v0 }
  0xcf   : > { %v351_v7 = vadd.f32 %v629_v55, %v350_v1 }
  0xd0   : > { %v391_v9 = vadd.f32 %v631_v57, %v390_v5 }
  0xd1   : > { %v355_v15 = vsel %vm354_vm5, %v629_v55, %v351_v7 }
  0xd2   : > { %v360_v17 = vsel %vm357_vm7, %v359_v8, %v355_v15  ;;  %v395_v19 = vsel %vm394_vm8, %v631_v57, %v391_v9 }
  0xd3   : > { %v361_v20 = vmul.f32 %v360_v17, %v336_v10  ;;  %v400_v21 = vsel %vm397_vm9, %v399_v16, %v395_v19 }
  0xd4   : > { %v401_v22 = vmul.f32 %v400_v21, %v376_v18 }
  0xd5   : > { %v560_v23 = vclamps-f32 %v361_v20, 1.0 }
  0xd6   : > { %v561_v26 = vclamps-f32 %v401_v22, 1.0 }
  0xd7   : > { %v404_v27 = vadd.f32 1.0, %v560_v23 }
  0xd8   : > { %v405_v29 = vadd.f32 1.0, %v561_v26 }
  0xd9   : > { %v406_v31 = vmul.f32 %v404_v27, %v320_v13 }
  0xda   : > { %v407_v33 = vmul.f32 %v405_v29, %v321_v28 }
  0xdb   : > { %v408_v34 = vmul.f32 %v406_v31, %v292_v30 }
  0xdc   : > { %v409_v35 = vmul.f32 %v407_v33, %v315_v32 }
  0xdd   : > { %410 = vst [vmem:[%s223_s15] sm:$0xff] %v408_v34 }
  0xde   : > { %411 = vst [vmem:[%s223_s15 + $0x8] sm:$0xff] %v409_v35 }
  0xdf   : > { %659 = shalt.err (!%p656_p5)
}
  0xe0   : > { %571 = dma.vmem_to_hbm [thread:$0]  (%p773_p4), %s431_s28, 256, %s433_s29, %s413_s30  }
  0xe1 PF: > { %p577_p6 = scmp.ge.s32.totalorder %s710_s17, 2  ;;  %s444_s11 = sand.u32 1, %s690_s12  }
  0xe2   : > { %s445_s18 = scalar_lea.sflag [#allocation3], %s444_s11 }
  0xe3   : > { %p574_p7 = pnand %p577_p6, %p780_p8 }
  0xe5   : > { %p575_p9 = pneg %p574_p7 }
  0xe7   : > { %685 = dma.done.wait (%p575_p9), %s445_s18, 256  }
  0xe8   : > { %687 = vsyncadd (%p575_p9), %s445_s18, 4294967040  ;;  %s16_s17 = sadd.s32 1, %s710_s17   ;;  %s870_s12 = smov %s694_s13 }
  0xe9   : > { %p13_p10 = scmp.ge.s32.totalorder %s16_s17, 4   ;;  %s871_s13 = smov %s698_s14 }
  0xea   : > { %s872_s14 = smov %s786_s25  ;;  %s873_s15 = smov %s706_s16 }
  0xeb   : > { %s874_s16 = smov %s876_s20  ;;  %15 = sbr.rel (!%p13_p10) target bundleno = 4 (0x4), region = 73 }
  0xf0   :  { %451 = vsyncpa [#allocation3], 1 }
  0xf1   :  { %453 = vsyncpa [#allocation3 + $0x1], 1 }

</bundles_post_ra>
